<compile_context>
chip_gen: v5e
topology: v5e:2x2
jax: 0.10.0
libtpu: 0.0.40
codegen_flags: <defaults>
</compile_context>

<pallas_src>
import functools

import jax
import jax.numpy as jnp
from jax.experimental import pallas as pl
from jax.experimental.pallas import tpu as pltpu


# ---------------------------------------------------------------------------
# Helpers
# ---------------------------------------------------------------------------
def _round_up(x, m):
    return ((x + m - 1) // m) * m


def _l2_normalize_rows(x, inv_scale=1.0):
    """F.normalize(p=2, dim=1): x / max(||x||, 1e-12), optionally * inv_scale.

    Works both on plain jnp arrays (wrapper prologue) and on values loaded
    from Refs (label-branch kernel). Zero rows stay exactly zero.
    """
    x32 = x.astype(jnp.float32)
    nsq = jnp.sum(x32 * x32, axis=1, keepdims=True)
    inv = jax.lax.rsqrt(jnp.maximum(nsq, jnp.float32(1e-24)))  # = 1/max(||x||,1e-12)
    return x32 * (inv * jnp.float32(inv_scale))


def _vmem_budget_bytes():
    """Per-call VMEM budget derived from the chip when possible (96 MiB cap on
    128-MiB v5e/v6e, 48 MiB on 64-MiB v7x / unknown)."""
    try:
        cap = getattr(pltpu.get_tpu_info(), "vmem_capacity_bytes", None)
        if cap:
            return int(min(cap * 3 // 4, 96 * 1024 * 1024))
    except Exception:
        pass
    return 48 * 1024 * 1024


def _choose_nolabel_tiles(B, D, itemsize, budget):
    """Pick (tb_r, tb_c, b_pad): working set ~= (4*tb_r + 2*tb_c)*D*itemsize."""
    # Small batches: a single tile (column tile multiple of 128 for lane-dense
    # accumulation, row tile = same padded size).
    if B <= 1024:
        b_pad = _round_up(B, 128)
        ws = 6 * b_pad * D * itemsize + b_pad * 128 * 4
        if ws <= budget:
            return b_pad, b_pad, b_pad
    # Large batches: biggest D-aware tile pair that fits the budget.
    for tb_r, tb_c in ((512, 1024), (512, 512), (256, 512),
                       (256, 256), (128, 256), (128, 128)):
        ws = (4 * tb_r + 2 * tb_c) * D * itemsize + tb_r * 128 * 4
        if ws <= budget:
            break
    b_pad = _round_up(B, max(tb_r, tb_c))
    return tb_r, tb_c, b_pad


def _choose_label_tiles(B, D, itemsize, budget):
    if B <= 1024:
        tb_r = _round_up(B, 8)
        return tb_r, tb_r
    for tb_r in (1024, 512, 256, 128):
        if 4 * tb_r * D * itemsize <= budget // 2:
            break
    return tb_r, _round_up(B, tb_r)


# ---------------------------------------------------------------------------
# Kernels
# ---------------------------------------------------------------------------
def _nolabel_kernel(p_ref, mrow_ref, mt_ref, out_ref, acc_ref, *, tb_c, pad_cols):
    """InfoNCE-style branch.

    per-row loss = log(sum_j exp(sim_ij) + 1e-8) - sim_ii, with sim already
    divided by temperature (folded into the pre-normalized protein rows).
    """
    j = pl.program_id(1)

    @pl.when(j == 0)
    def _():
        acc_ref[...] = jnp.zeros_like(acc_ref)

    # Pure MXU matmul: operands were normalized (and the LHS scaled by
    # 1/temperature) once in the wrapper.
    sim = jnp.dot(p_ref[...], mt_ref[...], preferred_element_type=jnp.float32)
    e = jnp.exp(sim)                                            # (tb_r, tb_c)

    # Lane-dense partial sums: VALU adds only; the 128->1 cross-lane (XLU)
    # reduction is deferred to the last column tile.
    part = e[:, 0:128]
    for c in range(1, tb_c // 128):
        part = part + e[:, c * 128:(c + 1) * 128]
    acc_ref[...] += part

    @pl.when(j == pl.num_programs(1) - 1)
    def _():
        denom = jnp.sum(acc_ref[...], axis=1, keepdims=True)    # (tb_r, 1)
        if pad_cols:
            # Padded molecule rows are exactly zero -> each padded column
            # contributed exp(0) = 1; remove them with one scalar subtract.
            denom = denom - jnp.float32(pad_cols)
        # pos_sim = diag(similarity) == rowwise dot of the matching rows
        # (protein side already carries the 1/temperature factor).
        pos = jnp.sum(p_ref[...].astype(jnp.float32) *
                      mrow_ref[...].astype(jnp.float32), axis=1, keepdims=True)
        out_ref[...] = jnp.log(denom + jnp.float32(1e-8)) - pos


def _label_kernel(p_ref, m_ref, y_ref, out_ref, *, inv_temp):
    """BCE-with-logits on the diagonal -- rowwise dot, no matmul, no (B,B)."""
    p_n = _l2_normalize_rows(p_ref[...])
    m_n = _l2_normalize_rows(m_ref[...])
    x = jnp.sum(p_n * m_n, axis=1, keepdims=True) * jnp.float32(inv_temp)
    y = y_ref[...].astype(jnp.float32)
    # Numerically stable BCE with logits (matches F.binary_cross_entropy_with_logits).
    out_ref[...] = jnp.maximum(x, 0.0) - x * y + jnp.log1p(jnp.exp(-jnp.abs(x)))


# ---------------------------------------------------------------------------
# Wrapper
# ---------------------------------------------------------------------------
def contrastive_loss(protein_embeds, molecule_embeds, labels=None, temperature=0.1,
                     *, use_bf16_matmul=False, tile_override=None):
    """Pallas implementation of ContrastiveLoss.forward. Returns a scalar."""
    B, D = protein_embeds.shape
    inv_temp = float(1.0 / temperature)
    budget = _vmem_budget_bytes()

    if labels is None:
        # Hoisted one-shot prologue (perf review): normalize both operands,
        # fold 1/temperature into the protein side, transpose molecule once.
        p_n = _l2_normalize_rows(protein_embeds, inv_temp)          # (B, D) f32
        m_n = _l2_normalize_rows(molecule_embeds)                   # (B, D) f32

        op_dtype = jnp.float32
        if use_bf16_matmul or protein_embeds.dtype == jnp.bfloat16:
            op_dtype = jnp.bfloat16
        p_n = p_n.astype(op_dtype)
        m_n = m_n.astype(op_dtype)
        itemsize = jnp.dtype(op_dtype).itemsize

        if tile_override is not None:
            tb_r, tb_c = tile_override
            b_pad = _round_up(B, max(tb_r, tb_c))
        else:
            tb_r, tb_c, b_pad = _choose_nolabel_tiles(B, D, itemsize, budget)
        assert tb_c % 128 == 0 and b_pad % tb_r == 0 and b_pad % tb_c == 0

        pad = b_pad - B
        if pad:
            p_n = jnp.pad(p_n, ((0, pad), (0, 0)))   # exact zeros
            m_n = jnp.pad(m_n, ((0, pad), (0, 0)))
        m_t = m_n.T                                   # one-time transpose

        kernel = functools.partial(_nolabel_kernel, tb_c=tb_c, pad_cols=pad)
        per_row = pl.pallas_call(
            kernel,
            out_shape=jax.ShapeDtypeStruct((b_pad, 1), jnp.float32),
            grid=(b_pad // tb_r, b_pad // tb_c),
            in_specs=[
                pl.BlockSpec((tb_r, D), lambda i, j: (i, 0)),   # protein rows (scaled)
                pl.BlockSpec((tb_r, D), lambda i, j: (i, 0)),   # molecule rows (diag)
                pl.BlockSpec((D, tb_c), lambda i, j: (0, j)),   # molecule^T columns
            ],
            out_specs=pl.BlockSpec((tb_r, 1), lambda i, j: (i, 0)),
            scratch_shapes=[pltpu.VMEM((tb_r, 128), jnp.float32)],
            compiler_params=pltpu.CompilerParams(
                dimension_semantics=("parallel", "arbitrary"),
                vmem_limit_bytes=budget),
        )(p_n, m_n, m_t)
        return jnp.mean(per_row[:B, 0])
    else:
        y = jnp.reshape(labels, (-1, 1)).astype(jnp.float32)        # labels.view(-1, 1)
        itemsize = jnp.dtype(protein_embeds.dtype).itemsize
        tb_r, b_pad = _choose_label_tiles(B, D, itemsize, budget)
        pad = b_pad - B
        p, m = protein_embeds, molecule_embeds
        if pad:
            p = jnp.pad(p, ((0, pad), (0, 0)))
            m = jnp.pad(m, ((0, pad), (0, 0)))
            y = jnp.pad(y, ((0, pad), (0, 0)))

        kernel = functools.partial(_label_kernel, inv_temp=inv_temp)
        per_row = pl.pallas_call(
            kernel,
            out_shape=jax.ShapeDtypeStruct((b_pad, 1), jnp.float32),
            grid=(b_pad // tb_r,),
            in_specs=[
                pl.BlockSpec((tb_r, D), lambda i: (i, 0)),
                pl.BlockSpec((tb_r, D), lambda i: (i, 0)),
                pl.BlockSpec((tb_r, 1), lambda i: (i, 0)),
            ],
            out_specs=pl.BlockSpec((tb_r, 1), lambda i: (i, 0)),
            compiler_params=pltpu.CompilerParams(
                dimension_semantics=("parallel",),
                vmem_limit_bytes=budget),
        )(p, m, y)
        return jnp.mean(per_row[:B, 0])


# ---------------------------------------------------------------------------
# Pure-JAX reference (sanity check)
# ---------------------------------------------------------------------------
def _reference(protein, molecule, labels=None, temperature=0.1):
    eps = 1e-12
    p = protein / jnp.maximum(jnp.linalg.norm(protein, axis=1, keepdims=True), eps)
    m = molecule / jnp.maximum(jnp.linalg.norm(molecule, axis=1, keepdims=True), eps)
    sim = (p @ m.T) / temperature
    diag = jnp.diag(sim)
    if labels is not None:
        y = jnp.reshape(labels, (-1,)).astype(jnp.float32)
        x = diag
        bce = jnp.maximum(x, 0.0) - x * y + jnp.log1p(jnp.exp(-jnp.abs(x)))
        return jnp.mean(bce)
    exp_sim = jnp.exp(sim)
    mask = 1.0 - jnp.eye(sim.shape[0], dtype=sim.dtype)
    neg = jnp.sum(exp_sim * mask, axis=1)
    loss = -jnp.log(jnp.exp(diag) / (jnp.exp(diag) + neg + 1e-8))
    return jnp.mean(loss)


# ---------------------------------------------------------------------------
if __name__ == "__main__":
    key = jax.random.PRNGKey(0)
    kp, km, kl = jax.random.split(key, 3)

    # Small shapes; B=6 exercises row/column padding + the pad-count subtraction.
    for B in (8, 6):
        D = 32
        protein_embeds = jax.random.normal(kp, (B, D), dtype=jnp.float32)
        molecule_embeds = jax.random.normal(km, (B, D), dtype=jnp.float32)
        labels = jax.random.bernoulli(kl, 0.5, (B,)).astype(jnp.float32)

        loss_nolabel = jax.block_until_ready(
            contrastive_loss(protein_embeds, molecule_embeds, None, 0.1))
        loss_label = jax.block_until_ready(
            contrastive_loss(protein_embeds, molecule_embeds, labels, 0.1))

        ref_nolabel = _reference(protein_embeds, molecule_embeds, None, 0.1)
        ref_label = _reference(protein_embeds, molecule_embeds, labels, 0.1)

        assert jnp.allclose(loss_nolabel, ref_nolabel, atol=1e-4, rtol=1e-4), (
            B, loss_nolabel, ref_nolabel)
        assert jnp.allclose(loss_label, ref_label, atol=1e-4, rtol=1e-4), (
            B, loss_label, ref_label)

    # Multi-tile grid path (forces 128x128 tiles): exercises the persistent
    # accumulator across column tiles + pad-count subtraction with B % tb_c != 0.
    B, D = 300, 64
    protein_embeds = jax.random.normal(kp, (B, D), dtype=jnp.float32)
    molecule_embeds = jax.random.normal(km, (B, D), dtype=jnp.float32)
    loss_mt = jax.block_until_ready(
        contrastive_loss(protein_embeds, molecule_embeds, None, 0.1,
                         tile_override=(128, 128)))
    ref_mt = _reference(protein_embeds, molecule_embeds, None, 0.1)
    assert jnp.allclose(loss_mt, ref_mt, atol=1e-3, rtol=1e-3), (loss_mt, ref_mt)

    # bf16-matmul fast path (looser tolerance: bf16 operand rounding).
    loss_bf16 = jax.block_until_ready(
        contrastive_loss(protein_embeds, molecule_embeds, None, 0.1,
                         use_bf16_matmul=True))
    assert jnp.allclose(loss_bf16, ref_mt, atol=1e-1), (loss_bf16, ref_mt)

    print("KERNEL_OK")
</pallas_src>

<mosaic_0001>
module attributes {stable_mosaic.version = 11 : i64} {
  func.func @_nolabel_kernel(%arg0: i32, %arg1: i32, %arg2: memref<128x32xf32, #tpu.memory_space<vmem>>, %arg3: memref<128x32xf32, #tpu.memory_space<vmem>>, %arg4: memref<32x128xf32, #tpu.memory_space<vmem>>, %arg5: memref<128x1xf32, #tpu.memory_space<vmem>>, %arg6: memref<128x128xf32, #tpu.memory_space<vmem>>) attributes {dimension_semantics = [#tpu.dimension_semantics<parallel>, #tpu.dimension_semantics<arbitrary>], iteration_bounds = array<i64: 1, 1>, scalar_prefetch = 0 : i64, scratch_operands = 1 : i64, tpu.core_type = #tpu.core_type<tc>, window_params = [{transform_indices = @transform_0, window_bounds = array<i64: 128, 32>}, {transform_indices = @transform_1, window_bounds = array<i64: 128, 32>}, {transform_indices = @transform_2, window_bounds = array<i64: 32, 128>}, {transform_indices = @transform_3, window_bounds = array<i64: 128, 1>}]} {
    %c0_i32 = arith.constant 0 : i32
    %0 = arith.cmpi eq, %arg1, %c0_i32 : i32
    %1 = arith.extui %0 : i1 to i32
    %c0_i32_0 = arith.constant 0 : i32
    %2 = arith.cmpi ne, %1, %c0_i32_0 : i32
    scf.if %2 {
      %cst_10 = arith.constant 0.000000e+00 : f32
      %13 = vector.broadcast %cst_10 : f32 to vector<128x128xf32>
      %c0_11 = arith.constant 0 : index
      %c0_12 = arith.constant 0 : index
      %14 = vector.load %arg6[%c0_11, %c0_12] : memref<128x128xf32, #tpu.memory_space<vmem>>, vector<128x128xf32>
      tpu.vector_store %arg6[%c0_11, %c0_12], %13 {strides = array<i32>} : memref<128x128xf32, #tpu.memory_space<vmem>>, vector<128x128xf32>,
    } else {
    }
    %c0 = arith.constant 0 : index
    %c0_1 = arith.constant 0 : index
    %3 = vector.load %arg2[%c0, %c0_1] : memref<128x32xf32, #tpu.memory_space<vmem>>, vector<128x32xf32>
    %c0_2 = arith.constant 0 : index
    %c0_3 = arith.constant 0 : index
    %4 = vector.load %arg4[%c0_2, %c0_3] : memref<32x128xf32, #tpu.memory_space<vmem>>, vector<32x128xf32>
    %cst = arith.constant dense<0.000000e+00> : vector<128x128xf32>
    %5 = tpu.matmul %3, %4, %cst {dimension_numbers = #tpu.dot_dimension_numbers<[1], [0], [0], [1], [0, 0, 1, 1], [], []>} : vector<128x32xf32>, vector<32x128xf32>, vector<128x128xf32> -> vector<128x128xf32>
    %6 = math.exp %5 : vector<128x128xf32>
    %c0_4 = arith.constant 0 : index
    %c0_5 = arith.constant 0 : index
    %7 = vector.load %arg6[%c0_4, %c0_5] : memref<128x128xf32, #tpu.memory_space<vmem>>, vector<128x128xf32>
    %8 = arith.addf %7, %6 : vector<128x128xf32>
    %c0_6 = arith.constant 0 : index
    %c0_7 = arith.constant 0 : index
    %9 = vector.load %arg6[%c0_6, %c0_7] : memref<128x128xf32, #tpu.memory_space<vmem>>, vector<128x128xf32>
    tpu.vector_store %arg6[%c0_6, %c0_7], %8 {strides = array<i32>} : memref<128x128xf32, #tpu.memory_space<vmem>>, vector<128x128xf32>,
    %c0_i32_8 = arith.constant 0 : i32
    %10 = arith.cmpi eq, %arg1, %c0_i32_8 : i32
    %11 = arith.extui %10 : i1 to i32
    %c0_i32_9 = arith.constant 0 : i32
    %12 = arith.cmpi ne, %11, %c0_i32_9 : i32
    scf.if %12 {
      %c0_10 = arith.constant 0 : index
      %c0_11 = arith.constant 0 : index
      %13 = vector.load %arg6[%c0_10, %c0_11] : memref<128x128xf32, #tpu.memory_space<vmem>>, vector<128x128xf32>
      %cst_12 = arith.constant dense<0.000000e+00> : vector<128xf32>
      %14 = vector.multi_reduction <add>, %13, %cst_12 [1] : vector<128x128xf32> to vector<128xf32>
      %15 = vector.shape_cast %14 : vector<128xf32> to vector<128x1xf32>
      %cst_13 = arith.constant 1.200000e+02 : f32
      %16 = vector.broadcast %cst_13 : f32 to vector<128x1xf32>
      %17 = arith.subf %15, %16 : vector<128x1xf32>
      %c0_14 = arith.constant 0 : index
      %c0_15 = arith.constant 0 : index
      %18 = vector.load %arg2[%c0_14, %c0_15] : memref<128x32xf32, #tpu.memory_space<vmem>>, vector<128x32xf32>
      %c0_16 = arith.constant 0 : index
      %c0_17 = arith.constant 0 : index
      %19 = vector.load %arg3[%c0_16, %c0_17] : memref<128x32xf32, #tpu.memory_space<vmem>>, vector<128x32xf32>
      %20 = arith.mulf %18, %19 : vector<128x32xf32>
      %cst_18 = arith.constant dense<0.000000e+00> : vector<128xf32>
      %21 = vector.multi_reduction <add>, %20, %cst_18 [1] : vector<128x32xf32> to vector<128xf32>
      %22 = vector.shape_cast %21 : vector<128xf32> to vector<128x1xf32>
      %cst_19 = arith.constant 9.99999993E-9 : f32
      %23 = vector.broadcast %cst_19 : f32 to vector<128x1xf32>
      %24 = arith.addf %17, %23 : vector<128x1xf32>
      %25 = math.log %24 : vector<128x1xf32>
      %26 = arith.subf %25, %22 : vector<128x1xf32>
      %c0_20 = arith.constant 0 : index
      %c0_21 = arith.constant 0 : index
      %27 = vector.load %arg5[%c0_20, %c0_21] : memref<128x1xf32, #tpu.memory_space<vmem>>, vector<128x1xf32>
      tpu.vector_store %arg5[%c0_20, %c0_21], %26 {strides = array<i32>} : memref<128x1xf32, #tpu.memory_space<vmem>>, vector<128x1xf32>,
    } else {
    }
    return
  }
  func.func @transform_0(%arg0: i32, %arg1: i32) -> (i32, i32) {
    %c0_i32 = arith.constant 0 : i32
    %c0_i32_0 = arith.constant 0 : i32
    return %arg0, %c0_i32 : i32, i32
  }
  func.func @transform_1(%arg0: i32, %arg1: i32) -> (i32, i32) {
    %c0_i32 = arith.constant 0 : i32
    %c0_i32_0 = arith.constant 0 : i32
    return %arg0, %c0_i32 : i32, i32
  }
  func.func @transform_2(%arg0: i32, %arg1: i32) -> (i32, i32) {
    %c0_i32 = arith.constant 0 : i32
    %c0_i32_0 = arith.constant 0 : i32
    return %c0_i32, %arg1 : i32, i32
  }
  func.func @transform_3(%arg0: i32, %arg1: i32) -> (i32, i32) {
    %c0_i32 = arith.constant 0 : i32
    %c0_i32_0 = arith.constant 0 : i32
    return %arg0, %c0_i32 : i32, i32
  }
}

</mosaic_0001>

<bundles_post_ra>
// kernel: tpu_custom_call.1
= control target key start
LH: loop header
LB: loop body
LE: loop exit
PB: predicated region body
PF: predicated region fallthrough
CT: control target
= control target key end

     0   :  { %vm54_vm0 = vcmask 261120   ;;  %vm475_vm1 = vcmask 7168   ;;  %s873_s2 = inlined_call_operand.vmem [shape: f32[32,128], index: 2, kind: input, shape index: {}]   ;;  %s874_s0 = inlined_call_operand.vmem [shape: f32[128,32], index: 0, kind: input, shape index: {}]   ;;  %s875_s1 = inlined_call_operand.vmem [shape: f32[128,32], index: 1, kind: input, shape index: {}]   ;;  %s876_s3 = inlined_call_operand.vmem [shape: f32[128,1], index: 3, kind: output, shape index: {}]  }
   0x1   :  { %v53_v0 = vld [vmem:[%s873_s2 + $0x18] sm:$0xff]  ;;  %v52_v1 = vld [vmem:[%s873_s2 + $0x10] sm:$0xff]  ;;  %v51_v2 = vld [vmem:[%s873_s2 + $0x8] sm:$0xff] }
   0x2   :  { %115 = vmatpush.msra.mxu0 %v53_v0  ;;  %528 = vmatpush.msra.mxu1 %v53_v0  ;;  %v50_v3 = vld [vmem:[%s873_s2] sm:$0xff]  ;;  %v36_v7 = vld [vmem:[%s874_s0 + $0x10] sm:$0xff]  ;;  %v35_v9 = vld [vmem:[%s874_s0 + $0x8] sm:$0xff] }
   0x3   :  { %530 = vmatpush.msra.mxu3 %v53_v0  ;;  %529 = vmatpush.msra.mxu2 %v53_v0  ;;  %v34_v4 = vld [vmem:[%s874_s0] sm:$0xff]  ;;  %v333_v8 = vld [vmem:[%s875_s1 + $0x10] sm:$0xff]  ;;  %v332_v11 = vld [vmem:[%s875_s1 + $0x8] sm:$0xff] }
   0x4   :  { %116 = vmatpush.msra.mxu0 %v52_v1  ;;  %531 = vmatpush.msra.mxu1 %v52_v1  ;;  %v38_v5 = vld [vmem:[%s874_s0 + $0x20] sm:$0xff]  ;;  %v349_v10 = vmul.f32 %v333_v8, %v36_v7  ;;  %v348_v14 = vmul.f32 %v332_v11, %v35_v9  ;;  %v336_v16 = vld [vmem:[%s875_s1 + $0x28] sm:$0xff]  ;;  %v334_v22 = vld [vmem:[%s875_s1 + $0x18] sm:$0xff] }
   0x5   :  { %533 = vmatpush.msra.mxu3 %v52_v1  ;;  %532 = vmatpush.msra.mxu2 %v52_v1  ;;  %v645_v6 = vld [vmem:[%s874_s0 + $0x60] sm:$0xff]  ;;  %v39_v19 = vld [vmem:[%s874_s0 + $0x28] sm:$0xff]  ;;  %v37_v24 = vld [vmem:[%s874_s0 + $0x18] sm:$0xff] }
   0x6   :  { %117 = vmatpush.msra.mxu0 %v51_v2  ;;  %534 = vmatpush.msra.mxu1 %v51_v2  ;;  %v331_v12 = vld [vmem:[%s875_s1] sm:$0xff]  ;;  %v369_v17 = vsel %vm54_vm0, %v349_v10, 0.0  ;;  %v366_v20 = vsel %vm54_vm0, %v348_v14, 0.0  ;;  %v352_v23 = vmul.f32 %v336_v16, %v39_v19  ;;  %v350_v26 = vmul.f32 %v334_v22, %v37_v24  ;;  %v691_v27 = vld [vmem:[%s874_s0 + $0x68] sm:$0xff]  ;;  %v707_v32 = vld [vmem:[%s874_s0 + $0x70] sm:$0xff] }
   0x7   :  { %536 = vmatpush.msra.mxu3 %v51_v2  ;;  %535 = vmatpush.msra.mxu2 %v51_v2  ;;  %v42_v13 = vld [vmem:[%s874_s0 + $0x40] sm:$0xff]  ;;  %v347_v15 = vmul.f32 %v331_v12, %v34_v4  ;;  %v43_v29 = vld [vmem:[%s874_s0 + $0x48] sm:$0xff]  ;;  %v40_v33 = vld [vmem:[%s874_s0 + $0x30] sm:$0xff] }
   0x8   :  { %118 = vmatpush.msra.mxu0 %v50_v3  ;;  %537 = vmatpush.msra.mxu1 %v50_v3  ;;  %v335_v18 = vld [vmem:[%s875_s1 + $0x20] sm:$0xff]  ;;  %v378_v28 = vsel %vm54_vm0, %v352_v23, 0.0  ;;  %v372_v31 = vsel %vm54_vm0, %v350_v26, 0.0  ;;  %v715_v34 = vld [vmem:[%s874_s0 + $0x50] sm:$0xff]  ;;  %v726_v35 = vld [vmem:[%s874_s0 + $0x78] sm:$0xff] }
   0x9   :  { %539 = vmatpush.msra.mxu3 %v50_v3  ;;  %496 = vmatmul.msk.f32.vlgmr.msra.gmra.mxu0 %vm54_vm0, %v34_v4  ;;  %v363_v21 = vsel %vm54_vm0, %v347_v15, 0.0  ;;  %v351_v25 = vmul.f32 %v335_v18, %v38_v5  ;;  %v41_v36 = vld [vmem:[%s874_s0 + $0x38] sm:$0xff]  ;;  %v339_v38 = vld [vmem:[%s875_s1 + $0x40] sm:$0xff]  ;;  %v337_v44 = vld [vmem:[%s875_s1 + $0x30] sm:$0xff] }
   0xa   :  { %500 = vmatmul.msk.f32.vlgmr.msra.gmra.mxu1 %vm54_vm0, %v38_v5  ;;  %508 = vmatmul.msk.f32.vlgmr.msra.gmra.mxu3 %vm54_vm0, %v645_v6  ;;  %v734_v37 = vld [vmem:[%s874_s0 + $0x58] sm:$0xff]  ;;  %v355_v40 = vmul.f32 %v339_v38, %v42_v13  ;;  %v353_v45 = vmul.f32 %v337_v44, %v40_v33  ;;  %v340_v47 = vld [vmem:[%s875_s1 + $0x48] sm:$0xff] }
   0xb   :  { %538 = vmatpush.msra.mxu2 %v50_v3  ;;  %370 = vadd.xlane.f32.xlu0 %v369_v17  ;;  %v375_v30 = vsel %vm54_vm0, %v351_v25, 0.0  ;;  %v338_v39 = vld [vmem:[%s875_s1 + $0x38] sm:$0xff]  ;;  %v356_v48 = vmul.f32 %v340_v47, %v43_v29  ;;  %v343_v47 = vld [vmem:[%s875_s1 + $0x60] sm:$0xff] }
   0xc   :  { %504 = vmatmul.msk.f32.vlgmr.msra.gmra.mxu2 %vm54_vm0, %v42_v13  ;;  %367 = vadd.xlane.f32.xlu2 %v366_v20  ;;  %v354_v41 = vmul.f32 %v338_v39, %v41_v36  ;;  %v387_v42 = vsel %vm54_vm0, %v355_v40, 0.0  ;;  %v381_v46 = vsel %vm54_vm0, %v353_v45, 0.0 }
   0xd   :  { %364 = vadd.xlane.f32.xlu1 %v363_v21  ;;  %v390_v49 = vsel %vm54_vm0, %v356_v48, 0.0 }
   0xe   :  { %v384_v43 = vsel %vm54_vm0, %v354_v41, 0.0 }
  0x11   :  { %497 = vmatmul.msk.f32.gmra.mxu0 %vm54_vm0, %v35_v9 }
  0x12   :  { %509 = vmatmul.msk.f32.gmra.mxu3 %vm54_vm0, %v691_v27  ;;  %501 = vmatmul.msk.f32.gmra.mxu1 %vm54_vm0, %v39_v19 }
  0x13   :  { %379 = vadd.xlane.f32.xlu0 %v378_v28 }
  0x14   :  { %505 = vmatmul.msk.f32.gmra.mxu2 %vm54_vm0, %v43_v29  ;;  %376 = vadd.xlane.f32.xlu2 %v375_v30 }
  0x15   :  { %373 = vadd.xlane.f32.xlu1 %v372_v31  ;;  %v341_v31 = vld [vmem:[%s875_s1 + $0x50] sm:$0xff] }
  0x16   :  { %v357_v38 = vmul.f32 %v341_v31, %v715_v34 }
  0x18   :  { %v393_v41 = vsel %vm54_vm0, %v357_v38, 0.0 }
  0x19   :  { %498 = vmatmul.msk.f32.gmra.mxu0 %vm54_vm0, %v36_v7 }
  0x1a   :  { %510 = vmatmul.msk.f32.gmra.mxu3 %vm54_vm0, %v707_v32  ;;  %502 = vmatmul.msk.f32.gmra.mxu1 %vm54_vm0, %v40_v33 }
  0x1b   :  { %388 = vadd.xlane.f32.xlu0 %v387_v42  ;;  %v342_v42 = vld [vmem:[%s875_s1 + $0x58] sm:$0xff] }
  0x1c   :  { %506 = vmatmul.msk.f32.gmra.mxu2 %vm54_vm0, %v715_v34  ;;  %385 = vadd.xlane.f32.xlu2 %v384_v43  ;;  %v344_v43 = vld [vmem:[%s875_s1 + $0x68] sm:$0xff]  ;;  %v358_v44 = vmul.f32 %v342_v42, %v734_v37 }
  0x1d   :  { %382 = vadd.xlane.f32.xlu1 %v381_v46  ;;  %v360_v34 = vmul.f32 %v344_v43, %v691_v27 }
  0x1e   :  { %v396_v46 = vsel %vm54_vm0, %v358_v44, 0.0 }
  0x1f   :  { %v402_v48 = vsel %vm54_vm0, %v360_v34, 0.0 }
  0x21   :  { %499 = vmatmul.msk.f32.gmra.mxu0 %vm54_vm0, %v37_v24 }
  0x22   :  { %511 = vmatmul.msk.f32.gmra.mxu3 %vm54_vm0, %v726_v35  ;;  %503 = vmatmul.msk.f32.gmra.mxu1 %vm54_vm0, %v41_v36 }
  0x24   :  { %507 = vmatmul.msk.f32.gmra.mxu2 %vm54_vm0, %v734_v37 }
  0x25   :  { %391 = vadd.xlane.f32.xlu1 %v390_v49  ;;  %v345_v49 = vld [vmem:[%s875_s1 + $0x70] sm:$0xff] }
  0x26   :  { %v361_v27 = vmul.f32 %v345_v49, %v707_v32 }
  0x80   :  { %v365_v32 = vpop.xlane.xlu1 %364 }
  0x86   :  { %v120_v50 = vpop.f32.mrf.mxu0 }
  0x87   :  { %v168_v51 = vmul.f32 1.442695, %v120_v50  ;;  %v132_v52 = vpop.f32.mrf.mxu1  ;;  %v359_v50 = vmul.f32 %v343_v47, %v645_v6  ;;  %v790_v6 = vpop.xlane.xlu2 %367 }
  0x88   :  { %v176_v53 = vmul.f32 1.442695, %v132_v52  ;;  %v346_v52 = vld [vmem:[%s875_s1 + $0x78] sm:$0xff] }
  0x89   :  { %540 = vpow2.f32 %v168_v51  ;;  %v399_v37 = vsel %vm54_vm0, %v359_v50, 0.0  ;;  %v405_v51 = vsel %vm54_vm0, %v361_v27, 0.0 }
  0x8a   :  { %542 = vpow2.f32 %v176_v53  ;;  %v362_v53 = vmul.f32 %v346_v52, %v726_v35 }
  0x8d   :  { %v156_v54 = vpop.f32.mrf.mxu3 }
  0x8e   :  { %v192_v55 = vmul.f32 1.442695, %v156_v54  ;;  %v123_v56 = vpop.f32.mrf.mxu0  ;;  %v408_v54 = vsel %vm54_vm0, %v362_v53, 0.0 }
  0x8f   :  { %v541_v57 = vpop.eup %540  ;;  %v144_v58 = vpop.f32.mrf.mxu2  ;;  %v170_v63 = vmul.f32 1.442695, %v123_v56 }
  0x90   :  { %v543_v59 = vpop.eup %542  ;;  %v184_v60 = vmul.f32 1.442695, %v144_v58  ;;  %267 = vadd.xlane.f32.xlu0 %v541_v57  ;;  %v135_v61 = vpop.f32.mrf.mxu1  ;;  %544 = vpow2.f32 %v192_v55 }
  0x91   :  { %275 = vadd.xlane.f32.xlu2 %v543_v59  ;;  %v178_v62 = vmul.f32 1.442695, %v135_v61  ;;  %v788_v55 = vpop.xlane.xlu0 %370  ;;  %v377_v57 = vpop.xlane.xlu2 %376 }
  0x92   :  { %546 = vpow2.f32 %v184_v60  ;;  %v794_v58 = vpop.xlane.xlu1 %373 }
  0x93   :  { %548 = vpow2.f32 %v178_v62 }
  0x95   :  { %v159_v0 = vpop.f32.mrf.mxu3 }
  0x96   :  { %v194_v1 = vmul.f32 1.442695, %v159_v0  ;;  %v545_v2 = vpop.eup %544  ;;  %v126_v4 = vpop.f32.mrf.mxu0 }
  0x97   :  { %v147_v3 = vpop.f32.mrf.mxu2  ;;  %v172_v7 = vmul.f32 1.442695, %v126_v4 }
  0x98   :  { %v547_v5 = vpop.eup %546  ;;  %550 = vpow2.f32 %v194_v1  ;;  %291 = vadd.xlane.f32.xlu0 %v545_v2  ;;  %v186_v9 = vmul.f32 1.442695, %v147_v3  ;;  %v138_v15 = vpop.f32.mrf.mxu1 }
  0x99   :  { %552 = vpow2.f32 %v170_v63  ;;  %283 = vadd.xlane.f32.xlu2 %v547_v5  ;;  %v549_v8 = vpop.eup %548  ;;  %v180_v17 = vmul.f32 1.442695, %v138_v15  ;;  %v792_v56 = vpop.xlane.xlu0 %379 }
  0x9a   :  { %554 = vpow2.f32 %v172_v7  ;;  %v796_v60 = vpop.xlane.xlu2 %385  ;;  %v798_v61 = vpop.xlane.xlu1 %382 }
  0x9d   :  { %v162_v10 = vpop.f32.mrf.mxu3 }
  0x9e   :  { %v551_v11 = vpop.eup %550  ;;  %v196_v12 = vmul.f32 1.442695, %v162_v10  ;;  %v129_v22 = vpop.f32.mrf.mxu0 }
  0x9f   :  { %v553_v13 = vpop.eup %552  ;;  %293 = vadd.xlane.f32.xlu1 %v551_v11  ;;  %v150_v14 = vpop.f32.mrf.mxu2  ;;  %v174_v25 = vmul.f32 1.442695, %v129_v22 }
  0xa0   :  { %556 = vpow2.f32 %v196_v12  ;;  %269 = vadd.xlane.f32.xlu0 %v553_v13  ;;  %v188_v16 = vmul.f32 1.442695, %v150_v14  ;;  %v555_v18 = vpop.eup %554  ;;  %v141_v30 = vpop.f32.mrf.mxu1 }
  0xa1   :  { %558 = vpow2.f32 %v186_v9  ;;  %277 = vadd.xlane.f32.xlu2 %v549_v8  ;;  %v182_v36 = vmul.f32 1.442695, %v141_v30  ;;  %v389_v59 = vpop.xlane.xlu0 %388 }
  0xa2   :  { %560 = vpow2.f32 %v188_v16  ;;  %v800_v3 = vpop.xlane.xlu1 %391 }
  0xa3   :  { %562 = vpow2.f32 %v180_v17 }
  0xa5   :  { %v165_v24 = vpop.f32.mrf.mxu3 }
  0xa6   :  { %v557_v19 = vpop.eup %556  ;;  %v198_v26 = vmul.f32 1.442695, %v165_v24 }
  0xa7   :  { %v559_v20 = vpop.eup %558  ;;  %v153_v21 = vpop.f32.mrf.mxu2  ;;  %271 = vadd.xlane.f32.xlu1 %v555_v18 }
  0xa8   :  { %v190_v23 = vmul.f32 1.442695, %v153_v21  ;;  %285 = vadd.xlane.f32.xlu0 %v559_v20  ;;  %v561_v28 = vpop.eup %560 }
  0xa9   :  { %295 = vadd.xlane.f32.xlu2 %v557_v19  ;;  %v563_v29 = vpop.eup %562 }
  0xaa   :  { %564 = vpow2.f32 %v190_v23 }
  0xab   :  { %566 = vpow2.f32 %v174_v25 }
  0xac   :  { %568 = vpow2.f32 %v198_v26 }
  0xad   :  { %570 = vpow2.f32 %v182_v36 }
  0xaf   :  { %287 = vadd.xlane.f32.xlu1 %v561_v28 }
  0xb0   :  { %v565_v33 = vpop.eup %564  ;;  %279 = vadd.xlane.f32.xlu0 %v563_v29 }
  0xb1   :  { %289 = vadd.xlane.f32.xlu2 %v565_v33  ;;  %v567_v39 = vpop.eup %566 }
  0xb2   :  { %v569_v40 = vpop.eup %568 }
  0xb3   :  { %v571_v45 = vpop.eup %570 }
  0xb7   :  { %273 = vadd.xlane.f32.xlu1 %v567_v39 }
  0xb8   :  { %297 = vadd.xlane.f32.xlu0 %v569_v40 }
  0xb9   :  { %394 = vadd.xlane.f32.xlu2 %v393_v41 }
  0xbf   :  { %281 = vadd.xlane.f32.xlu1 %v571_v45 }
  0xc0   :  { %397 = vadd.xlane.f32.xlu0 %v396_v46 }
  0xc1   :  { %403 = vadd.xlane.f32.xlu2 %v402_v48 }
  0xc7   :  { %400 = vadd.xlane.f32.xlu1 %v399_v37 }
  0xc8   :  { %406 = vadd.xlane.f32.xlu0 %v405_v51 }
  0xcf   :  { %409 = vadd.xlane.f32.xlu1 %v408_v54 }
 0x103   :  { %v268_v62 = vpop.xlane.xlu0 %267 }
 0x104   :  { %v276_v35 = vpop.xlane.xlu2 %275  ;;  %v512_v63 = vadd.f32 -120.0, %v268_v62 }
 0x105   :  { %v516_v0 = vadd.f32 -120.0, %v276_v35 }
 0x106   :  { %v411_v1 = vadd.f32 1e-08, %v512_v63 }
 0x107   :  { %v415_v2 = vadd.f32 1e-08, %v516_v0 }
 0x108   :  { %572 = vlog2.f32 %v411_v1 }
 0x109   :  { %574 = vlog2.f32 %v415_v2 }
 0x10b   :  { %v292_v4 = vpop.xlane.xlu0 %291 }
 0x10c   :  { %v284_v5 = vpop.xlane.xlu2 %283 }
 0x10d   :  { %v520_v7 = vadd.f32 -120.0, %v284_v5 }
 0x10e   :  { %v573_v8 = vpop.eup %572 }
 0x10f   :  { %v575_v9 = vpop.eup %574  ;;  %v428_v10 = vmul.f32 0.6931472, %v573_v8  ;;  %v419_v11 = vadd.f32 1e-08, %v520_v7 }
 0x110   :  { %v436_v12 = vmul.f32 0.6931472, %v575_v9 }
 0x111   :  { %v459_v13 = vsub.f32 %v428_v10, %v365_v32  ;;  %576 = vlog2.f32 %v419_v11 }
 0x112   :  { %v463_v14 = vsub.f32 %v436_v12, %v377_v57  ;;  %v294_v15 = vpop.xlane.xlu1 %293 }
 0x113   :  { %476 = vst.msk [vmem:[%s876_s3] sm:$0xff] %vm475_vm1, %v459_v13  ;;  %v270_v16 = vpop.xlane.xlu0 %269  ;;  %v525_v42 = vadd.f32 -120.0, %v294_v15 }
 0x114   :  { %480 = vst.msk [vmem:[%s876_s3 + $0x20] sm:$0xff] %vm475_vm1, %v463_v14  ;;  %v278_v17 = vpop.xlane.xlu2 %277  ;;  %v513_v18 = vadd.f32 -120.0, %v270_v16 }
 0x115   :  { %v517_v19 = vadd.f32 -120.0, %v278_v17  ;;  %v424_v37 = vadd.f32 1e-08, %v525_v42 }
 0x116   :  { %v412_v20 = vadd.f32 1e-08, %v513_v18 }
 0x117   :  { %v577_v21 = vpop.eup %576  ;;  %v416_v22 = vadd.f32 1e-08, %v517_v19 }
 0x118   :  { %v444_v23 = vmul.f32 0.6931472, %v577_v21  ;;  %578 = vlog2.f32 %v412_v20 }
 0x119   :  { %580 = vlog2.f32 %v416_v22 }
 0x11a   :  { %v467_v24 = vsub.f32 %v444_v23, %v389_v59  ;;  %v272_v25 = vpop.xlane.xlu1 %271 }
 0x11b   :  { %v514_v26 = vadd.f32 -120.0, %v272_v25  ;;  %v286_v28 = vpop.xlane.xlu0 %285 }
 0x11c   :  { %484 = vst.msk [vmem:[%s876_s3 + $0x40] sm:$0xff] %vm475_vm1, %v467_v24  ;;  %v296_v29 = vpop.xlane.xlu2 %295  ;;  %v521_v30 = vadd.f32 -120.0, %v286_v28 }
 0x11d   :  { %v413_v31 = vadd.f32 1e-08, %v514_v26 }
 0x11e   :  { %v579_v33 = vpop.eup %578  ;;  %v420_v36 = vadd.f32 1e-08, %v521_v30 }
 0x11f   :  { %v581_v38 = vpop.eup %580  ;;  %v430_v39 = vmul.f32 0.6931472, %v579_v33  ;;  %582 = vlog2.f32 %v413_v31 }
 0x120   :  { %v438_v40 = vmul.f32 0.6931472, %v581_v38  ;;  %584 = vlog2.f32 %v420_v36 }
 0x121   :  { %v460_v41 = vsub.f32 %v430_v39, %v790_v6  ;;  %v524_v6 = vadd.f32 -120.0, %v292_v4 }
 0x122   :  { %v464_v43 = vsub.f32 %v438_v40, %v792_v56  ;;  %v288_v44 = vpop.xlane.xlu1 %287  ;;  %v526_v56 = vadd.f32 -120.0, %v296_v29 }
 0x123   :  { %477 = vst.msk [vmem:[%s876_s3 + $0x8] sm:$0xff] %vm475_vm1, %v460_v41  ;;  %v522_v34 = vadd.f32 -120.0, %v288_v44  ;;  %v280_v45 = vpop.xlane.xlu0 %279 }
 0x124   :  { %481 = vst.msk [vmem:[%s876_s3 + $0x28] sm:$0xff] %vm475_vm1, %v464_v43  ;;  %v290_v46 = vpop.xlane.xlu2 %289  ;;  %v518_v47 = vadd.f32 -120.0, %v280_v45  ;;  %v425_v1 = vadd.f32 1e-08, %v526_v56 }
 0x125   :  { %v583_v48 = vpop.eup %582  ;;  %v421_v49 = vadd.f32 1e-08, %v522_v34  ;;  %v523_v50 = vadd.f32 -120.0, %v290_v46 }
 0x126   :  { %v585_v27 = vpop.eup %584  ;;  %v432_v51 = vmul.f32 0.6931472, %v583_v48  ;;  %v417_v52 = vadd.f32 1e-08, %v518_v47 }
 0x127   :  { %v446_v53 = vmul.f32 0.6931472, %v585_v27  ;;  %586 = vlog2.f32 %v421_v49  ;;  %v422_v54 = vadd.f32 1e-08, %v523_v50 }
 0x128   :  { %v461_v32 = vsub.f32 %v432_v51, %v788_v55  ;;  %588 = vlog2.f32 %v417_v52  ;;  %v423_v55 = vadd.f32 1e-08, %v524_v6 }
 0x129   :  { %v468_v57 = vsub.f32 %v446_v53, %v800_v3  ;;  %590 = vlog2.f32 %v422_v54 }
 0x12a   :  { %592 = vlog2.f32 %v424_v37  ;;  %478 = vst.msk [vmem:[%s876_s3 + $0x10] sm:$0xff] %vm475_vm1, %v461_v32  ;;  %v274_v59 = vpop.xlane.xlu1 %273 }
 0x12b   :  { %485 = vst.msk [vmem:[%s876_s3 + $0x48] sm:$0xff] %vm475_vm1, %v468_v57  ;;  %v515_v62 = vadd.f32 -120.0, %v274_v59  ;;  %v298_v35 = vpop.xlane.xlu0 %297 }
 0x12c   :  { %v395_v63 = vpop.xlane.xlu2 %394  ;;  %v527_v10 = vadd.f32 -120.0, %v298_v35 }
 0x12d   :  { %v587_v0 = vpop.eup %586  ;;  %v414_v2 = vadd.f32 1e-08, %v515_v62 }
 0x12e   :  { %v589_v3 = vpop.eup %588  ;;  %v448_v4 = vmul.f32 0.6931472, %v587_v0  ;;  %v426_v17 = vadd.f32 1e-08, %v527_v10 }
 0x12f   :  { %v591_v5 = vpop.eup %590  ;;  %v440_v7 = vmul.f32 0.6931472, %v589_v3  ;;  %594 = vlog2.f32 %v414_v2 }
 0x130   :  { %v593_v8 = vpop.eup %592  ;;  %596 = vlog2.f32 %v423_v55  ;;  %v469_v9 = vsub.f32 %v448_v4, %v395_v63  ;;  %v450_v11 = vmul.f32 0.6931472, %v591_v5 }
 0x131   :  { %598 = vlog2.f32 %v425_v1  ;;  %v465_v12 = vsub.f32 %v440_v7, %v798_v61  ;;  %v454_v15 = vmul.f32 0.6931472, %v593_v8 }
 0x132   :  { %486 = vst.msk [vmem:[%s876_s3 + $0x50] sm:$0xff] %vm475_vm1, %v469_v9  ;;  %v282_v13 = vpop.xlane.xlu1 %281 }
 0x133   :  { %482 = vst.msk [vmem:[%s876_s3 + $0x30] sm:$0xff] %vm475_vm1, %v465_v12  ;;  %v519_v14 = vadd.f32 -120.0, %v282_v13  ;;  %v398_v16 = vpop.xlane.xlu0 %397 }
 0x134   :  { %v404_v18 = vpop.xlane.xlu2 %403  ;;  %v470_v19 = vsub.f32 %v450_v11, %v398_v16 }
 0x135   :  { %v595_v20 = vpop.eup %594  ;;  %v418_v21 = vadd.f32 1e-08, %v519_v14  ;;  %v472_v61 = vsub.f32 %v454_v15, %v404_v18 }
 0x136   :  { %v597_v22 = vpop.eup %596  ;;  %v434_v23 = vmul.f32 0.6931472, %v595_v20  ;;  %487 = vst.msk [vmem:[%s876_s3 + $0x58] sm:$0xff] %vm475_vm1, %v470_v19 }
 0x137   :  { %v599_v24 = vpop.eup %598  ;;  %600 = vlog2.f32 %v418_v21  ;;  %489 = vst.msk [vmem:[%s876_s3 + $0x68] sm:$0xff] %vm475_vm1, %v472_v61  ;;  %v452_v26 = vmul.f32 0.6931472, %v597_v22 }
 0x138   :  { %v462_v25 = vsub.f32 %v434_v23, %v794_v58  ;;  %602 = vlog2.f32 %v426_v17  ;;  %v456_v29 = vmul.f32 0.6931472, %v599_v24 }
 0x13a   :  { %479 = vst.msk [vmem:[%s876_s3 + $0x18] sm:$0xff] %vm475_vm1, %v462_v25  ;;  %v401_v28 = vpop.xlane.xlu1 %400 }
 0x13b   :  { %v471_v30 = vsub.f32 %v452_v26, %v401_v28  ;;  %v407_v31 = vpop.xlane.xlu0 %406 }
 0x13c   :  { %v473_v33 = vsub.f32 %v456_v29, %v407_v31 }
 0x13d   :  { %v601_v36 = vpop.eup %600  ;;  %488 = vst.msk [vmem:[%s876_s3 + $0x60] sm:$0xff] %vm475_vm1, %v471_v30 }
 0x13e   :  { %v603_v38 = vpop.eup %602  ;;  %v442_v58 = vmul.f32 0.6931472, %v601_v36  ;;  %490 = vst.msk [vmem:[%s876_s3 + $0x70] sm:$0xff] %vm475_vm1, %v473_v33 }
 0x13f   :  { %v458_v40 = vmul.f32 0.6931472, %v603_v38 }
 0x140   :  { %v466_v39 = vsub.f32 %v442_v58, %v796_v60 }
 0x142   :  { %483 = vst.msk [vmem:[%s876_s3 + $0x38] sm:$0xff] %vm475_vm1, %v466_v39  ;;  %v410_v41 = vpop.xlane.xlu1 %409 }
 0x143   :  { %v474_v42 = vsub.f32 %v458_v40, %v410_v41 }
 0x145   :  { %491 = vst.msk [vmem:[%s876_s3 + $0x78] sm:$0xff] %vm475_vm1, %v474_v42 }

</bundles_post_ra>
